<compile_context>
chip_gen: v7x
topology: tpu7x:2x2x1
jax: 0.10.0
libtpu: 0.0.40
codegen_flags: <defaults>
</compile_context>

<pallas_src>
import jax
import jax.numpy as jnp
from jax.experimental import pallas as pl
from jax.experimental.pallas import tpu as pltpu

_WIDTH_CANDIDATES = (4096, 2048, 1024, 512, 256, 128)
_TARGET_TILE_BYTES = 2 * 1024 * 1024   # ~2 MiB per buffer; 4x that (in+out, 2-deep) = 8 MiB VMEM
_FLOOR_TILE_BYTES = 1 * 1024 * 1024    # don't shrink below ~1 MiB/buffer when splitting for v7x


def _hswish_kernel(x_ref, o_ref):
    x = x_ref[...]
    # x * relu6(x + 3) / 6, with the divide folded into a single VALU multiply.
    # Computed in the input dtype (matches PyTorch hardswish semantics).
    y = x * jnp.clip(x + 3.0, 0.0, 6.0) * (1.0 / 6.0)
    o_ref[...] = y.astype(o_ref.dtype)


def _round_up(v, m):
    return -(-v // m) * m


def _pick_width(total):
    for w in _WIDTH_CANDIDATES:
        if total % w == 0:
            return w
    return None


def _pick_tile_rows(rows, width, itemsize):
    row_bytes = width * itemsize
    mult = max(8, 32 // itemsize)  # sublane multiple: 8 (f32) / 16 (bf16) / 32 (int8-class)
    pref = max(mult, (_TARGET_TILE_BYTES // row_bytes // mult) * mult)   # ~2 MiB / buffer
    floor = max(mult, (_FLOOR_TILE_BYTES // row_bytes // mult) * mult)   # ~1 MiB / buffer
    # Keep >= ~4 grid steps (when the floor allows it) so v7x's two TCs both get work.
    quarter = max(mult, _round_up(pl.cdiv(rows, 4), mult))
    tr = min(pref, max(quarter, floor))
    if tr >= rows:
        # Single block; block dims equal the full array dims, which is always legal.
        return rows
    return tr


def _hswish_impl(x):
    orig_shape = x.shape
    total = x.size
    if total == 0:
        return x

    width = _pick_width(total)
    if width is None:
        # Ragged element count (not a multiple of 128) -- rare for NN tensors.
        # pallas_call is a custom call, so a pad before / slice after would each
        # add a full extra HBM pass; a fused XLA elementwise is already at the
        # HBM roofline, so use it directly on this path.
        return x * jnp.clip(x + 3.0, 0.0, 6.0) * (1.0 / 6.0)

    rows = total // width
    x2d = x.reshape(rows, width)  # contiguous reshape: layout bitcast, no extra HBM copy
    itemsize = jnp.dtype(x.dtype).itemsize
    tile_rows = _pick_tile_rows(rows, width, itemsize)
    grid = (pl.cdiv(rows, tile_rows),)

    out2d = pl.pallas_call(
        _hswish_kernel,
        out_shape=jax.ShapeDtypeStruct((rows, width), x.dtype),
        grid_spec=pl.GridSpec(
            grid=grid,
            in_specs=[pl.BlockSpec((tile_rows, width), lambda i: (i, 0))],
            out_specs=pl.BlockSpec((tile_rows, width), lambda i: (i, 0)),
        ),
        compiler_params=pltpu.CompilerParams(
            dimension_semantics=("parallel",),
        ),
    )(x2d)
    return out2d.reshape(orig_shape)


# jit the wrapper so the (bitcast) reshapes stay metadata-only and shape logic
# is resolved at trace time.
hswish = jax.jit(_hswish_impl)


def _hswish_ref(x):
    return x * jnp.clip(x + 3.0, 0.0, 6.0) / 6.0


if __name__ == "__main__":
    key = jax.random.PRNGKey(0)
    # NCHW input, small shape consistent with the module: batch=2, channels=4, spatial=16x16
    x = jax.random.normal(key, (2, 4, 16, 16), dtype=jnp.float32) * 4.0

    y = hswish(x)
    jax.block_until_ready(y)

    y_ref = _hswish_ref(x)
    assert y.shape == x.shape and y.dtype == x.dtype
    assert jnp.allclose(y, y_ref, atol=1e-6, rtol=1e-5)

    print("KERNEL_OK")
</pallas_src>

<mosaic_0001>
module attributes {stable_mosaic.version = 11 : i64} {
  func.func @_hswish_kernel(%arg0: i32, %arg1: memref<1x2048xf32, #tpu.memory_space<vmem>>, %arg2: memref<1x2048xf32, #tpu.memory_space<vmem>>) attributes {dimension_semantics = [#tpu.dimension_semantics<parallel>], iteration_bounds = array<i64: 1>, scalar_prefetch = 0 : i64, scratch_operands = 0 : i64, tpu.core_type = #tpu.core_type<tc>, window_params = [{transform_indices = @transform_0, window_bounds = array<i64: 1, 2048>}, {transform_indices = @transform_1, window_bounds = array<i64: 1, 2048>}]} {
    %c0 = arith.constant 0 : index
    %c0_0 = arith.constant 0 : index
    %0 = vector.load %arg1[%c0, %c0_0] : memref<1x2048xf32, #tpu.memory_space<vmem>>, vector<1x2048xf32>
    %cst = arith.constant 3.000000e+00 : f32
    %1 = vector.broadcast %cst : f32 to vector<1x2048xf32>
    %2 = arith.addf %0, %1 : vector<1x2048xf32>
    %cst_1 = arith.constant 0.000000e+00 : f32
    %cst_2 = arith.constant 6.000000e+00 : f32
    %3 = vector.broadcast %cst_1 : f32 to vector<1x2048xf32>
    %4 = arith.maximumf %3, %2 : vector<1x2048xf32>
    %5 = vector.broadcast %cst_2 : f32 to vector<1x2048xf32>
    %6 = arith.minimumf %5, %4 : vector<1x2048xf32>
    %7 = arith.mulf %0, %6 : vector<1x2048xf32>
    %cst_3 = arith.constant 0.166666672 : f32
    %8 = vector.broadcast %cst_3 : f32 to vector<1x2048xf32>
    %9 = arith.mulf %7, %8 : vector<1x2048xf32>
    %c0_4 = arith.constant 0 : index
    %c0_5 = arith.constant 0 : index
    %10 = vector.load %arg2[%c0_4, %c0_5] : memref<1x2048xf32, #tpu.memory_space<vmem>>, vector<1x2048xf32>
    tpu.vector_store %arg2[%c0_4, %c0_5], %9 {strides = array<i32>} : memref<1x2048xf32, #tpu.memory_space<vmem>>, vector<1x2048xf32>,
    return
  }
  func.func @transform_0(%arg0: i32) -> (i32, i32) {
    %c0_i32 = arith.constant 0 : i32
    %c0_i32_0 = arith.constant 0 : i32
    return %arg0, %c0_i32 : i32, i32
  }
  func.func @transform_1(%arg0: i32) -> (i32, i32) {
    %c0_i32 = arith.constant 0 : i32
    %c0_i32_0 = arith.constant 0 : i32
    return %arg0, %c0_i32 : i32, i32
  }
}

</mosaic_0001>

<bundles_post_ra>
// kernel: _hswish_impl.1
= control target key start
LH: loop header
LB: loop body
LE: loop exit
PB: predicated region body
PF: predicated region fallthrough
CT: control target
= control target key end

     0   :  { %s48_s0 = inlined_call_operand.vmem [shape: f32[1,2048], index: 0, kind: input, shape index: {}]   ;;  %s49_s1 = inlined_call_operand.vmem [shape: f32[1,2048], index: 1, kind: output, shape index: {}]  }
   0x1   :  { %v8_v0 = vld [vmem:[%s48_s0] sm:$0xff]  ;;  %v9_v1 = vld [vmem:[%s48_s0 + $0x8] sm:$0xff] }
   0x2   :  { %v10_v2 = vadd.f32 3.0, %v8_v0  ;;  %v11_v3 = vadd.f32 3.0, %v9_v1 }
   0x4   :  { %v12_v4 = vmax.f32 %v10_v2, 0.0  ;;  %v13_v5 = vmax.f32 %v11_v3, 0.0 }
   0x6   :  { %v14_v6 = vmin.f32 %v12_v4, 6.0  ;;  %v15_v7 = vmin.f32 %v13_v5, 6.0 }
   0x8   :  { %v16_v8 = vmul.f32 %v14_v6, %v8_v0  ;;  %v17_v9 = vmul.f32 %v15_v7, %v9_v1 }
   0xa   :  { %v18_v10 = vmul.f32 0.16666667, %v16_v8  ;;  %v19_v11 = vmul.f32 0.16666667, %v17_v9 }
   0xc   :  { %20 = vst [vmem:[%s49_s1] sm:$0xff] %v18_v10  ;;  %21 = vst [vmem:[%s49_s1 + $0x8] sm:$0xff] %v19_v11 }

</bundles_post_ra>
